<compile_context>
chip_gen: v7x
topology: tpu7x:2x2x1
jax: 0.10.0
libtpu: 0.0.40
codegen_flags: <defaults>
</compile_context>

<pallas_src>
import functools

import jax
import jax.numpy as jnp
from jax import lax
from jax.experimental import pallas as pl
from jax.experimental.pallas import tpu as pltpu

_VMEM_LIMIT_BYTES = 40 * 1024 * 1024  # scoped-VMEM cap: safe on v5e/v6e (128 MiB) and v7x (64 MiB)


# --------------------------------------------------------------------------- #
# Kernels
# --------------------------------------------------------------------------- #
def _stats_kernel(x_ref, piv_ref, sum_ref, sq_ref, *,
                  nb, hw, tn, thw, mask_batch, mask_lanes):
    """Per-batch-tile partial sums of (x - pivot) and (x - pivot)^2 per channel.

    Outputs are per-i partials (out block index depends only on i), so the i
    grid axis can be "parallel" (megacore-shardable) without racing a shared
    accumulator.  Init happens at the first HW tile of each batch tile.
    """
    i = pl.program_id(0)
    j = pl.program_id(1)

    @pl.when(j == 0)
    def _():
        sum_ref[...] = jnp.zeros_like(sum_ref)
        sq_ref[...] = jnp.zeros_like(sq_ref)

    x = x_ref[...].astype(jnp.float32)                     # (tn, CC, thw)
    xc = x - piv_ref[...].astype(jnp.float32)              # pivot broadcast (CC, 1)

    if mask_lanes or mask_batch:                           # static (trace-time) branch
        valid = None
        if mask_lanes:
            lane_ids = lax.broadcasted_iota(jnp.int32, xc.shape, 2)
            valid = lane_ids < (hw - j * thw)
        if mask_batch:
            b_ids = lax.broadcasted_iota(jnp.int32, xc.shape, 0)
            bmask = b_ids < (nb - i * tn)
            valid = bmask if valid is None else jnp.logical_and(valid, bmask)
        xc = jnp.where(valid, xc, 0.0)

    sum_ref[...] += jnp.sum(xc, axis=(0, 2), keepdims=True)       # (1, CC, 1)
    sq_ref[...] += jnp.sum(xc * xc, axis=(0, 2), keepdims=True)   # (1, CC, 1)


def _norm_kernel(x_ref, scale_ref, shift_ref, y_ref):
    """y = x * scale + shift with per-channel (CC, 1) folded scale/shift."""
    x = x_ref[...].astype(jnp.float32)                     # (tn, CC, thw)
    y_ref[...] = (x * scale_ref[...] + shift_ref[...]).astype(y_ref.dtype)


# --------------------------------------------------------------------------- #
# Tiling helpers
# --------------------------------------------------------------------------- #
def _pick_group(n, c, itemsize):
    """Fold g batch images into the channel (sublane) axis when C under-fills a vreg."""
    pack = max(1, 32 // max(1, itemsize))   # sublanes worth of rows per vreg: 8 f32, 16 bf16
    g = 1
    while c * g < pack and n % (2 * g) == 0:
        g *= 2
    return g


def _pick_tiles(nb, cc, hw, itemsize, target_bytes):
    """Choose (tn, thw): ~target_bytes per block, lane-dense (thw % 128 == 0 or thw == hw)."""
    row_bytes = cc * hw * itemsize          # one batch-row's worth of data
    if row_bytes >= target_bytes:
        lanes = max(1, target_bytes // (cc * itemsize))
        thw = max(128, (lanes // 128) * 128)
        thw = min(thw, hw)
        return 1, thw
    tn = int(max(1, min(nb, target_bytes // row_bytes)))
    return tn, hw


# --------------------------------------------------------------------------- #
# Forward
# --------------------------------------------------------------------------- #
def bn_forward(x_nchw, weight, bias, running_var, running_mean, eps=1e-5, *,
               stats_target_bytes=8 << 20, norm_target_bytes=4 << 20):
    """Returns (y_nchw, new_running_var, new_running_mean)."""
    n, c, h, w = x_nchw.shape
    hw = h * w
    count = n * hw                                    # reduction size per channel
    factor = count / (count - 1) if count > 1 else 1.0
    itemsize = jnp.dtype(x_nchw.dtype).itemsize

    g = _pick_group(n, c, itemsize)                   # fold factor for small C
    nb, cc = n // g, g * c
    x3d = x_nchw.reshape(nb, cc, hw)                  # contiguous view, no transpose

    # Cheap per-channel pivot: conditions the E[(x-p)^2] - E[x-p]^2 variance formula.
    pivot_c = x_nchw[0, :, 0, 0].astype(jnp.float32)                # (C,)
    pivot = jnp.tile(pivot_c, (g,)).reshape(cc, 1)                  # (CC, 1)

    # ---- phase 1: per-channel sufficient statistics (streamed, partials per batch tile) ----
    tn1, thw1 = _pick_tiles(nb, cc, hw, itemsize, stats_target_bytes)
    grid1 = (pl.cdiv(nb, tn1), pl.cdiv(hw, thw1))
    stats_kernel = functools.partial(
        _stats_kernel, nb=nb, hw=hw, tn=tn1, thw=thw1,
        mask_batch=(nb % tn1) != 0, mask_lanes=(hw % thw1) != 0)

    part_sum, part_sq = pl.pallas_call(
        stats_kernel,
        out_shape=(
            jax.ShapeDtypeStruct((grid1[0], cc, 1), jnp.float32),
            jax.ShapeDtypeStruct((grid1[0], cc, 1), jnp.float32),
        ),
        grid_spec=pltpu.PrefetchScalarGridSpec(
            num_scalar_prefetch=0,
            grid=grid1,
            in_specs=[
                pl.BlockSpec((tn1, cc, thw1), lambda i, j: (i, 0, j)),
                pl.BlockSpec((cc, 1), lambda i, j: (0, 0)),
            ],
            out_specs=(
                pl.BlockSpec((1, cc, 1), lambda i, j: (i, 0, 0)),
                pl.BlockSpec((1, cc, 1), lambda i, j: (i, 0, 0)),
            ),
        ),
        compiler_params=pltpu.CompilerParams(
            dimension_semantics=("parallel", "arbitrary"),
            vmem_limit_bytes=_VMEM_LIMIT_BYTES),
        cost_estimate=pl.CostEstimate(
            flops=4 * n * c * hw, transcendentals=0,
            bytes_accessed=n * c * hw * itemsize),
    )(x3d, pivot)

    # ---- tiny (C,)-sized math in plain JAX: reduce partials, fold affine, running stats ----
    s1 = jnp.sum(part_sum[:, :, 0], axis=0).reshape(g, c).sum(axis=0)   # sum(x - p)
    s2 = jnp.sum(part_sq[:, :, 0], axis=0).reshape(g, c).sum(axis=0)    # sum((x - p)^2)
    cnt = jnp.float32(count)
    mean_c = s1 / cnt                                                   # E[x] - p
    mean = pivot_c + mean_c                                             # E[x]
    var = jnp.maximum(s2 / cnt - mean_c * mean_c, 0.0)                  # biased variance
    inv_std = lax.rsqrt(var + jnp.float32(eps))

    scale_c = inv_std * weight.astype(jnp.float32)                      # (C,)
    shift_c = bias.astype(jnp.float32) - mean * scale_c                 # (C,)
    scale = jnp.tile(scale_c, (g,)).reshape(cc, 1)
    shift = jnp.tile(shift_c, (g,)).reshape(cc, 1)

    new_rv = (running_var.astype(jnp.float32) * 0.9
              + var * (0.1 * factor)).astype(running_var.dtype)
    new_rm = (running_mean.astype(jnp.float32) * 0.9
              + mean * 0.1).astype(running_mean.dtype)

    # ---- phase 2: elementwise normalize (megacore-parallel, lane-dense) ----
    tn2, thw2 = _pick_tiles(nb, cc, hw, itemsize, norm_target_bytes)
    grid2 = (pl.cdiv(nb, tn2), pl.cdiv(hw, thw2))
    x_spec2 = pl.BlockSpec((tn2, cc, thw2), lambda i, j: (i, 0, j))
    ch_spec = pl.BlockSpec((cc, 1), lambda i, j: (0, 0))

    y3d = pl.pallas_call(
        _norm_kernel,
        out_shape=jax.ShapeDtypeStruct((nb, cc, hw), x_nchw.dtype),
        grid_spec=pltpu.PrefetchScalarGridSpec(
            num_scalar_prefetch=0,
            grid=grid2,
            in_specs=[x_spec2, ch_spec, ch_spec],
            out_specs=x_spec2,
        ),
        compiler_params=pltpu.CompilerParams(
            dimension_semantics=("parallel", "parallel"),
            vmem_limit_bytes=_VMEM_LIMIT_BYTES),
        cost_estimate=pl.CostEstimate(
            flops=2 * n * c * hw, transcendentals=0,
            bytes_accessed=2 * n * c * hw * itemsize),
    )(x3d, scale, shift)

    return y3d.reshape(n, c, h, w), new_rv, new_rm


# --------------------------------------------------------------------------- #
# Pure-JAX reference + tests
# --------------------------------------------------------------------------- #
def _reference(x_nchw, weight, bias, running_var, running_mean, eps=1e-5):
    x = x_nchw.astype(jnp.float32)
    mean = jnp.mean(x, axis=(0, 2, 3))
    var = jnp.var(x, axis=(0, 2, 3))  # biased
    r = x.shape[0] * x.shape[2] * x.shape[3]
    factor = r / (r - 1)
    nrv = running_var * 0.9 + var * (0.1 * factor)
    nrm = running_mean * 0.9 + mean * 0.1
    y = (x - mean[None, :, None, None]) / jnp.sqrt(var[None, :, None, None] + eps) \
        * weight[None, :, None, None] + bias[None, :, None, None]
    return y.astype(x_nchw.dtype), nrv, nrm


def _check(x, **kw):
    c = x.shape[1]
    weight_bn = jnp.ones((c,), jnp.float32)
    bias_bn = jnp.zeros((c,), jnp.float32)
    rv = jnp.ones((c,), jnp.float32)
    rm = jnp.zeros((c,), jnp.float32)

    y, nrv, nrm = bn_forward(x, weight_bn, bias_bn, rv, rm, **kw)
    y = jax.block_until_ready(y)
    nrv = jax.block_until_ready(nrv)
    nrm = jax.block_until_ready(nrm)

    y_ref, rv_ref, rm_ref = _reference(x, weight_bn, bias_bn, rv, rm)
    assert jnp.allclose(y, y_ref, atol=1e-4, rtol=1e-4)
    assert jnp.allclose(nrv, rv_ref, atol=1e-4, rtol=1e-4)
    assert jnp.allclose(nrm, rm_ref, atol=1e-4, rtol=1e-4)


if __name__ == "__main__":
    key = jax.random.PRNGKey(0)
    k1, k2, k3 = jax.random.split(key, 3)

    # Primary case (matches the module-sized example): small C -> N folded into sublanes.
    x_main = jax.random.normal(k1, (2, 4, 16, 16), dtype=jnp.float32)
    _check(x_main)

    # Ragged lane tiling path (HW not a multiple of 128) with tiny forced block target.
    x_rag_lanes = jax.random.normal(k2, (2, 8, 10, 20), dtype=jnp.float32)
    _check(x_rag_lanes, stats_target_bytes=4096, norm_target_bytes=4096)

    # Ragged batch tiling path (nb % tn != 0) with tiny forced block target.
    x_rag_batch = jax.random.normal(k3, (3, 8, 4, 32), dtype=jnp.float32)
    _check(x_rag_batch, stats_target_bytes=8192, norm_target_bytes=8192)

    # TODO(synk): module's train_bn=False path (normalize with running stats) not exercised here.
    print("KERNEL_OK")
</pallas_src>

<mosaic_0001>
module attributes {stable_mosaic.version = 11 : i64} {
  func.func @_stats_kernel(%arg0: i32, %arg1: i32, %arg2: memref<1x8x256xf32, #tpu.memory_space<vmem>>, %arg3: memref<8x1xf32, #tpu.memory_space<vmem>>, %arg4: memref<1x8x1xf32, #tpu.memory_space<vmem>>, %arg5: memref<1x8x1xf32, #tpu.memory_space<vmem>>) attributes {dimension_semantics = [#tpu.dimension_semantics<parallel>, #tpu.dimension_semantics<arbitrary>], iteration_bounds = array<i64: 1, 1>, scalar_prefetch = 0 : i64, scratch_operands = 0 : i64, tpu.core_type = #tpu.core_type<tc>, window_params = [{transform_indices = @transform_0, window_bounds = array<i64: 1, 8, 256>}, {pipeline_mode = #tpu.pipeline_mode<synchronous>, transform_indices = @transform_1, window_bounds = array<i64: 8, 1>}, {transform_indices = @transform_2, window_bounds = array<i64: 1, 8, 1>}, {transform_indices = @transform_3, window_bounds = array<i64: 1, 8, 1>}]} {
    %c0_i32 = arith.constant 0 : i32
    %0 = arith.cmpi eq, %arg1, %c0_i32 : i32
    %1 = arith.extui %0 : i1 to i32
    %c0_i32_0 = arith.constant 0 : i32
    %2 = arith.cmpi ne, %1, %c0_i32_0 : i32
    scf.if %2 {
      %cst_18 = arith.constant 0.000000e+00 : f32
      %19 = vector.broadcast %cst_18 : f32 to vector<1x8x1xf32>
      %c0_19 = arith.constant 0 : index
      %c0_20 = arith.constant 0 : index
      %c0_21 = arith.constant 0 : index
      %20 = vector.load %arg4[%c0_19, %c0_20, %c0_21] : memref<1x8x1xf32, #tpu.memory_space<vmem>>, vector<1x8x1xf32>
      tpu.vector_store %arg4[%c0_19, %c0_20, %c0_21], %19 {strides = array<i32>} : memref<1x8x1xf32, #tpu.memory_space<vmem>>, vector<1x8x1xf32>,
      %cst_22 = arith.constant 0.000000e+00 : f32
      %21 = vector.broadcast %cst_22 : f32 to vector<1x8x1xf32>
      %c0_23 = arith.constant 0 : index
      %c0_24 = arith.constant 0 : index
      %c0_25 = arith.constant 0 : index
      %22 = vector.load %arg5[%c0_23, %c0_24, %c0_25] : memref<1x8x1xf32, #tpu.memory_space<vmem>>, vector<1x8x1xf32>
      tpu.vector_store %arg5[%c0_23, %c0_24, %c0_25], %21 {strides = array<i32>} : memref<1x8x1xf32, #tpu.memory_space<vmem>>, vector<1x8x1xf32>,
    } else {
    }
    %c0 = arith.constant 0 : index
    %c0_1 = arith.constant 0 : index
    %c0_2 = arith.constant 0 : index
    %3 = vector.load %arg2[%c0, %c0_1, %c0_2] : memref<1x8x256xf32, #tpu.memory_space<vmem>>, vector<1x8x256xf32>
    %c0_3 = arith.constant 0 : index
    %c0_4 = arith.constant 0 : index
    %4 = vector.load %arg3[%c0_3, %c0_4] : memref<8x1xf32, #tpu.memory_space<vmem>>, vector<8x1xf32>
    %5 = vector.shape_cast %4 : vector<8x1xf32> to vector<1x8x1xf32>
    %6 = vector.broadcast %5 : vector<1x8x1xf32> to vector<1x8x256xf32>
    %7 = arith.subf %3, %6 : vector<1x8x256xf32>
    %c0_5 = arith.constant 0 : index
    %c0_6 = arith.constant 0 : index
    %c0_7 = arith.constant 0 : index
    %8 = vector.load %arg4[%c0_5, %c0_6, %c0_7] : memref<1x8x1xf32, #tpu.memory_space<vmem>>, vector<1x8x1xf32>
    %cst = arith.constant dense<0.000000e+00> : vector<8xf32>
    %9 = vector.multi_reduction <add>, %7, %cst [0, 2] : vector<1x8x256xf32> to vector<8xf32>
    %10 = vector.shape_cast %9 : vector<8xf32> to vector<1x8x1xf32>
    %11 = arith.addf %8, %10 : vector<1x8x1xf32>
    %c0_8 = arith.constant 0 : index
    %c0_9 = arith.constant 0 : index
    %c0_10 = arith.constant 0 : index
    %12 = vector.load %arg4[%c0_8, %c0_9, %c0_10] : memref<1x8x1xf32, #tpu.memory_space<vmem>>, vector<1x8x1xf32>
    tpu.vector_store %arg4[%c0_8, %c0_9, %c0_10], %11 {strides = array<i32>} : memref<1x8x1xf32, #tpu.memory_space<vmem>>, vector<1x8x1xf32>,
    %c0_11 = arith.constant 0 : index
    %c0_12 = arith.constant 0 : index
    %c0_13 = arith.constant 0 : index
    %13 = vector.load %arg5[%c0_11, %c0_12, %c0_13] : memref<1x8x1xf32, #tpu.memory_space<vmem>>, vector<1x8x1xf32>
    %14 = arith.mulf %7, %7 : vector<1x8x256xf32>
    %cst_14 = arith.constant dense<0.000000e+00> : vector<8xf32>
    %15 = vector.multi_reduction <add>, %14, %cst_14 [0, 2] : vector<1x8x256xf32> to vector<8xf32>
    %16 = vector.shape_cast %15 : vector<8xf32> to vector<1x8x1xf32>
    %17 = arith.addf %13, %16 : vector<1x8x1xf32>
    %c0_15 = arith.constant 0 : index
    %c0_16 = arith.constant 0 : index
    %c0_17 = arith.constant 0 : index
    %18 = vector.load %arg5[%c0_15, %c0_16, %c0_17] : memref<1x8x1xf32, #tpu.memory_space<vmem>>, vector<1x8x1xf32>
    tpu.vector_store %arg5[%c0_15, %c0_16, %c0_17], %17 {strides = array<i32>} : memref<1x8x1xf32, #tpu.memory_space<vmem>>, vector<1x8x1xf32>,
    return
  }
  func.func @transform_0(%arg0: i32, %arg1: i32) -> (i32, i32, i32) {
    %c0_i32 = arith.constant 0 : i32
    %c0_i32_0 = arith.constant 0 : i32
    return %arg0, %c0_i32, %arg1 : i32, i32, i32
  }
  func.func @transform_1(%arg0: i32, %arg1: i32) -> (i32, i32) {
    %c0_i32 = arith.constant 0 : i32
    %c0_i32_0 = arith.constant 0 : i32
    %c0_i32_1 = arith.constant 0 : i32
    return %c0_i32, %c0_i32_0 : i32, i32
  }
  func.func @transform_2(%arg0: i32, %arg1: i32) -> (i32, i32, i32) {
    %c0_i32 = arith.constant 0 : i32
    %c0_i32_0 = arith.constant 0 : i32
    %c0_i32_1 = arith.constant 0 : i32
    return %arg0, %c0_i32, %c0_i32_0 : i32, i32, i32
  }
  func.func @transform_3(%arg0: i32, %arg1: i32) -> (i32, i32, i32) {
    %c0_i32 = arith.constant 0 : i32
    %c0_i32_0 = arith.constant 0 : i32
    %c0_i32_1 = arith.constant 0 : i32
    return %arg0, %c0_i32, %c0_i32_0 : i32, i32, i32
  }
}

</mosaic_0001>

<bundles_post_ra>
// kernel: tpu_custom_call.1
= control target key start
LH: loop header
LB: loop body
LE: loop exit
PB: predicated region body
PF: predicated region fallthrough
CT: control target
= control target key end

     0   :  { %9 = vsyncpa [#allocation3], 0  ;;  %s94_s12 = smov [#allocation2]   ;;  %s154_s0 = inlined_call_operand.hbm [shape: f32[1,8,256], index: 0, kind: input, shape index: {}]   ;;  %s155_s1 = inlined_call_operand.vmem [shape: f32[8,1], index: 1, kind: input, shape index: {}]   ;;  %s156_s2 = inlined_call_operand.vmem [shape: f32[1,8,1], index: 2, kind: output, shape index: {0}]   ;;  %s157_s3 = inlined_call_operand.vmem [shape: f32[1,8,1], index: 3, kind: output, shape index: {1}]  }
   0x1   :  { %s16_s13 = sshll.u32 %s94_s12, 4  ;;  %s70_s16 = scalar_lea.hbm %s154_s0, 256  ;;  %s17_s13 = int_to_ptr.vmem [resolvable:$true] %s16_s13 }
   0x2   :  { %p71_p0 = scmp.ne.s32.totalorder %s154_s0, %s70_s16  ;;  %p74_p1 = scmp.lt.u32.totalorder %s70_s16, %s154_s0 }
   0x4   :  { %p76_p2 = pnand %p74_p1, %p71_p0 }
   0x6   :  { %79 = shalt.err (!%p76_p2)
}
   0x7   :  { %s80_s21 = scalar_lea.vmem %s17_s13, 256  ;;  %p85_p4 = scmp.lt.s32.totalorder %s17_s13, %s17_s13 }
   0x8   :  { %p81_p3 = scmp.ne.s32.totalorder %s17_s13, %s80_s21  ;;  %p86_p5 = scmp.lt.s32.totalorder %s80_s21, %s80_s21 }
   0xa   :  { %p87_p6 = por %p86_p5, %p85_p4 }
   0xc   :  { %p88_p7 = pnand %p87_p6, %p81_p3 }
   0xe   :  { %91 = shalt.err (!%p88_p7)
}
   0xf   :  { %19 = dma.hbm_to_vmem [thread:$0]  %s154_s0, 256, %s17_s13, [#allocation3]  }
  0x10   :  { %92 = dma.done.wait [#allocation3], 256  }
  0x11   :  { %93 = vsyncadd [#allocation3], 4294967040  ;;  %v95_v0 = vmov 0   ;;  %v34_v1 = vld [vmem:[%s155_s1] sm:$0xff]  ;;  %vm29_vm0 = vcmask 7168   ;;  %v96_v2 = vmov 0.0  }
  0x12   :  { %69 = vset.pattern.permute.xlu0 %v95_v0  ;;  %30 = vst.msk [vmem:[%s156_s2] sm:$0xff] %vm29_vm0, %v96_v2  ;;  %31 = vst.msk [vmem:[%s157_s3] sm:$0xff] %vm29_vm0, %v96_v2  ;;  %v32_v3 = vld [vmem:[#allocation2] sm:$0xff]  ;;  %v33_v4 = vld [vmem:[#allocation2 + $0x8] sm:$0xff] }
  0x13   :  { %37 = vperm.xlu0 %69, %v34_v1  }
  0x19   :  { %v42_v12 = vld [vmem:[%s156_s2] sm:$0xff] }
  0x1a   :  { %v49_v14 = vld [vmem:[%s157_s3] sm:$0xff] }
  0x92   :  { %v38_v5 = vpop.permute.xlu0 %37 }
  0x93   :  { %v40_v6 = vsub.f32 %v32_v3, %v38_v5  ;;  %v41_v7 = vsub.f32 %v33_v4, %v38_v5 }
  0x95   :  { %v43_v8 = vadd.f32 %v41_v7, %v40_v6  ;;  %v50_v9 = vmul.f32 %v40_v6, %v40_v6  ;;  %v51_v10 = vmul.f32 %v41_v7, %v41_v7 }
  0x97   :  { %44 = vadd.xlane.f32.xlu0 %v43_v8  ;;  %v52_v11 = vadd.f32 %v51_v10, %v50_v9 }
  0x99   :  { %53 = vadd.xlane.f32.xlu1 %v52_v11 }
 0x124   :  { %v45_v13 = vpop.xlane.xlu0 %44 }
 0x125   :  { %v46_v15 = vadd.f32 %v45_v13, %v42_v12 }
 0x126   :  { %v54_v16 = vpop.xlane.xlu1 %53 }
 0x127   :  { %48 = vst.msk [vmem:[%s156_s2] sm:$0xff] %vm29_vm0, %v46_v15  ;;  %v55_v17 = vadd.f32 %v54_v16, %v49_v14 }
 0x129   :  { %56 = vst.msk [vmem:[%s157_s3] sm:$0xff] %vm29_vm0, %v55_v17 }
 0x12a   :  { %65 = vsyncpa [#allocation3], 1 }

</bundles_post_ra>
